<compile_context>
chip_gen: v7x
topology: tpu7x:2x2x1
jax: 0.10.0
libtpu: 0.0.40
codegen_flags: <defaults>
</compile_context>

<pallas_src>
import numpy as np
import jax
import jax.numpy as jnp
from jax.experimental import pallas as pl
from jax.experimental.pallas import tpu as pltpu

EMBED = 2        # embed_size (must be 2 for the original cat/view to type-check)
HIDDEN = 32      # hidden_size (multiple of 8 -> aligned slab slices / lane-dense out)
N_ROWS = 7       # rows per sample (the "7 samples" axis in the original module)
N_OUT = 7        # fc_2 output features

# --- parameter-slab row layout (every block START is 8-aligned) ----------------
MOD_OFF, MOD_K = 0, 7 * EMBED        # rows [ 0:16): folded mod block   (14 used, 2 zero)
HOUR_OFF, HOUR_K = 16, 24            # rows [16:40): folded hour block  (24 used)
WD_OFF, WD_K = 40, 7                 # rows [40:48): folded weekday blk ( 7 used, 1 zero)
MON_OFF, MON_K = 48, 12              # rows [48:64): folded month block (12 used, 4 zero)
W2_OFF = 64                          # rows [64:96): fc_2 weight^T, cols 7..31 zero
B1_ROW = W2_OFF + HIDDEN             # row 96: folded fc_1 bias
B2_ROW = B1_ROW + 1                  # row 97: fc_2 bias, cols 7..31 zero
SLAB_ROWS = B1_ROW + 8               # 104 (bias block padded to an 8-row tile)


def _madafaka_kernel(mod_ref, hour_ref, wd_ref, mon_ref, slab_ref, out_ref):
    """One grid step = one sample.

    mod_ref  [7, 14]   hour_ref [7, 24]   wd_ref [7, 7]   mon_ref [7, 12]
    slab_ref [104, 32] (VMEM-resident across the whole grid)
    out_ref  [7, 32]   (columns >= 7 are exactly zero by construction)
    """
    f32 = jnp.float32
    acc = jnp.dot(mod_ref[...], slab_ref[MOD_OFF:MOD_OFF + MOD_K, :],
                  preferred_element_type=f32)
    acc = acc + jnp.dot(hour_ref[...], slab_ref[HOUR_OFF:HOUR_OFF + HOUR_K, :],
                        preferred_element_type=f32)
    acc = acc + jnp.dot(wd_ref[...], slab_ref[WD_OFF:WD_OFF + WD_K, :],
                        preferred_element_type=f32)
    acc = acc + jnp.dot(mon_ref[...], slab_ref[MON_OFF:MON_OFF + MON_K, :],
                        preferred_element_type=f32)
    h = jnp.tanh(acc + slab_ref[B1_ROW:B1_ROW + 1, :])                      # [7, 32]
    out_ref[...] = (jnp.dot(h, slab_ref[W2_OFF:W2_OFF + HIDDEN, :],
                            preferred_element_type=f32)
                    + slab_ref[B2_ROW:B2_ROW + 1, :])                       # [7, 32]


def init_params(key, hidden=HIDDEN, embed=EMBED):
    """Deterministic nn.Linear-style init: U(-1/sqrt(fan_in), 1/sqrt(fan_in))."""
    def lin(k, fan_in, fan_out):
        kw, kb = jax.random.split(k)
        bound = 1.0 / (fan_in ** 0.5)
        w = jax.random.uniform(kw, (fan_out, fan_in), jnp.float32, -bound, bound)
        b = jax.random.uniform(kb, (fan_out,), jnp.float32, -bound, bound)
        return w, b

    k1, k2, k3, k4, k5 = jax.random.split(key, 5)
    wh, bh = lin(k1, 24, embed)                       # hour_embedding
    ww, bw = lin(k2, 7, embed)                        # weekday_embedding
    wm, bm = lin(k3, 12, embed)                       # month_embedding
    w1, b1 = lin(k4, 7 * 2 + embed * 3, hidden)       # fc_1 (in=20)
    w2, b2 = lin(k5, hidden, 7)                       # fc_2
    return dict(wh=wh, bh=bh, ww=ww, bw=bw, wm=wm, bm=bm,
                w1=w1, b1=b1, w2=w2, b2=b2)


def pack_params(params):
    """One-time host-side fold + pack into a single [SLAB_ROWS, HIDDEN] f32 slab.

    The three embedding Linears are folded into fc_1 (float64, so no extra
    rounding vs. the reference math):
        hour_emb @ W1^T[14:16] == hour_t @ (Wh^T @ W1^T[14:16]) + bh @ W1^T[14:16]
    (and likewise for weekday / month).

    Invariant relied on by the kernel: every pad row / pad column in the slab is
    exactly zero (rows 14:16, 47:48, 60:64, 98:104; columns 7:32 of the fc_2
    weight/bias rows), so the un-padded input tiles and the lane-dense output
    are exact.
    """
    f64 = lambda a: np.asarray(a, dtype=np.float64)
    wh, bh = f64(params["wh"]), f64(params["bh"])
    ww, bw = f64(params["ww"]), f64(params["bw"])
    wm, bm = f64(params["wm"]), f64(params["bm"])
    w1T = f64(params["w1"]).T                          # [20, HIDDEN]
    b1 = f64(params["b1"])
    w2T = f64(params["w2"]).T                          # [HIDDEN, 7]
    b2 = f64(params["b2"])

    slab = np.zeros((SLAB_ROWS, HIDDEN), dtype=np.float64)
    slab[MOD_OFF:MOD_OFF + MOD_K] = w1T[0:14]                    # mod-flat block
    slab[HOUR_OFF:HOUR_OFF + HOUR_K] = wh.T @ w1T[14:16]         # hour block   [24, H]
    slab[WD_OFF:WD_OFF + WD_K] = ww.T @ w1T[16:18]               # weekday blk  [ 7, H]
    slab[MON_OFF:MON_OFF + MON_K] = wm.T @ w1T[18:20]            # month block  [12, H]
    slab[W2_OFF:W2_OFF + HIDDEN, 0:N_OUT] = w2T
    slab[B1_ROW, :] = b1 + bh @ w1T[14:16] + bw @ w1T[16:18] + bm @ w1T[18:20]
    slab[B2_ROW, 0:N_OUT] = b2
    return jnp.asarray(slab, dtype=jnp.float32)


@jax.jit
def madafaka_forward(hour_t, weekday_t, month_t, mod_t, slab):
    """Batched forward.

    hour_t [B,7,24], weekday_t [B,7,7], month_t [B,7,12], mod_t [B,7,7,EMBED],
    slab [SLAB_ROWS, HIDDEN] from pack_params.
    Returns [B, 7, HIDDEN]; columns 0..6 are fc_2's output, columns 7..31 are
    exactly zero (lane-dense store; slice [..., :7] at the consumer).
    """
    B = hour_t.shape[0]
    f32 = jnp.float32
    # Contiguous last-two-dim merge: a pure view, no extra data movement.
    mod_flat = mod_t.reshape(B, N_ROWS, 7 * EMBED).astype(f32)

    per_sample = lambda last2: pl.BlockSpec((None,) + last2, lambda b: (b, 0, 0))
    k_total = MOD_K + HOUR_K + WD_K + MON_K
    flops = B * 2 * N_ROWS * (k_total * HIDDEN + HIDDEN * HIDDEN)
    bytes_accessed = 4 * (B * N_ROWS * k_total + SLAB_ROWS * HIDDEN
                          + B * N_ROWS * HIDDEN)

    return pl.pallas_call(
        _madafaka_kernel,
        grid=(B,),
        in_specs=[
            per_sample((N_ROWS, MOD_K)),      # mod_flat [B, 7, 14]
            per_sample((N_ROWS, HOUR_K)),     # hour_t   [B, 7, 24]
            per_sample((N_ROWS, WD_K)),       # weekday  [B, 7, 7]
            per_sample((N_ROWS, MON_K)),      # month    [B, 7, 12]
            # Constant index_map: the slab is DMA'd once and stays VMEM-resident
            # for the whole grid instead of being re-fetched per sample.
            pl.BlockSpec((SLAB_ROWS, HIDDEN), lambda b: (0, 0)),
        ],
        out_specs=per_sample((N_ROWS, HIDDEN)),
        out_shape=jax.ShapeDtypeStruct((B, N_ROWS, HIDDEN), f32),
        compiler_params=pltpu.CompilerParams(
            dimension_semantics=("parallel",)),   # shards batch across v7x's 2 TCs
        cost_estimate=pl.CostEstimate(
            flops=flops,
            transcendentals=B * N_ROWS * HIDDEN,
            bytes_accessed=bytes_accessed,
        ),
    )(mod_flat, hour_t.astype(f32), weekday_t.astype(f32), month_t.astype(f32), slab)


def simple_model_madafaka(hour_t, weekday_t, month_t, mod_t, slab):
    """Module-equivalent single-sample forward ([7,24],[7,7],[7,12],[7,7,2] -> [7,7])."""
    out = madafaka_forward(hour_t[None], weekday_t[None], month_t[None], mod_t[None], slab)
    return out[0, :, :N_OUT]


if __name__ == "__main__":
    B = 4
    key = jax.random.PRNGKey(0)
    k1, k2, k3, k4, kp = jax.random.split(key, 5)

    hour_t = jax.random.normal(k1, (B, N_ROWS, 24), jnp.float32)
    weekday_t = jax.random.normal(k2, (B, N_ROWS, 7), jnp.float32)
    month_t = jax.random.normal(k3, (B, N_ROWS, 12), jnp.float32)
    mod_t = jax.random.normal(k4, (B, N_ROWS, 7, EMBED), jnp.float32)

    params = init_params(kp)
    slab = pack_params(params)            # one-time offline fold + pack

    out = madafaka_forward(hour_t, weekday_t, month_t, mod_t, slab)
    out = jax.block_until_ready(out)

    # Pure-JAX reference against the ORIGINAL (unfolded) math.
    def ref_one(h_, w_, m_, mod_):
        he = h_ @ params["wh"].T + params["bh"]
        we = w_ @ params["ww"].T + params["bw"]
        me = m_ @ params["wm"].T + params["bm"]
        x = jnp.concatenate([mod_.reshape(N_ROWS, 7 * EMBED), he, we, me], axis=-1)
        return jnp.tanh(x @ params["w1"].T + params["b1"]) @ params["w2"].T + params["b2"]

    ref = jax.vmap(ref_one)(hour_t, weekday_t, month_t, mod_t)     # [B, 7, 7]

    assert out.shape == (B, N_ROWS, HIDDEN)
    # atol 1e-4: the algebraic fold changes fp summation order slightly.
    assert jnp.allclose(out[..., :N_OUT], ref, atol=1e-4, rtol=1e-4), \
        float(jnp.max(jnp.abs(out[..., :N_OUT] - ref)))
    # Padding lanes must be exactly zero (invariant consumers may rely on).
    assert bool(jnp.all(out[..., N_OUT:] == 0.0))

    # Module-signature single-sample path.
    out1 = jax.block_until_ready(
        simple_model_madafaka(hour_t[0], weekday_t[0], month_t[0], mod_t[0], slab))
    assert out1.shape == (N_ROWS, N_OUT)
    assert jnp.allclose(out1, ref[0], atol=1e-4, rtol=1e-4)

    print("KERNEL_OK")
</pallas_src>

<mosaic_0001>
module attributes {stable_mosaic.version = 11 : i64} {
  func.func @_madafaka_kernel(%arg0: i32, %arg1: memref<1x7x14xf32, #tpu.memory_space<vmem>>, %arg2: memref<1x7x24xf32, #tpu.memory_space<vmem>>, %arg3: memref<1x7x7xf32, #tpu.memory_space<vmem>>, %arg4: memref<1x7x12xf32, #tpu.memory_space<vmem>>, %arg5: memref<104x32xf32, #tpu.memory_space<vmem>>, %arg6: memref<1x7x32xf32, #tpu.memory_space<vmem>>) attributes {dimension_semantics = [#tpu.dimension_semantics<parallel>], iteration_bounds = array<i64: 4>, scalar_prefetch = 0 : i64, scratch_operands = 0 : i64, tpu.core_type = #tpu.core_type<tc>, window_params = [{transform_indices = @transform_0, window_bounds = array<i64: 1, 7, 14>}, {transform_indices = @transform_1, window_bounds = array<i64: 1, 7, 24>}, {transform_indices = @transform_2, window_bounds = array<i64: 1, 7, 7>}, {transform_indices = @transform_3, window_bounds = array<i64: 1, 7, 12>}, {pipeline_mode = #tpu.pipeline_mode<synchronous>, transform_indices = @transform_4, window_bounds = array<i64: 104, 32>}, {transform_indices = @transform_5, window_bounds = array<i64: 1, 7, 32>}]} {
    %c0 = arith.constant 0 : index
    %c0_0 = arith.constant 0 : index
    %c0_1 = arith.constant 0 : index
    %0 = vector.load %arg1[%c0, %c0_0, %c0_1] : memref<1x7x14xf32, #tpu.memory_space<vmem>>, vector<1x7x14xf32>
    %1 = vector.shape_cast %0 : vector<1x7x14xf32> to vector<7x14xf32>
    %c0_2 = arith.constant 0 : index
    %c0_3 = arith.constant 0 : index
    %2 = vector.load %arg5[%c0_2, %c0_3] : memref<104x32xf32, #tpu.memory_space<vmem>>, vector<14x32xf32>
    %cst = arith.constant dense<0.000000e+00> : vector<7x32xf32>
    %3 = tpu.matmul %1, %2, %cst {dimension_numbers = #tpu.dot_dimension_numbers<[1], [0], [0], [1], [0, 0, 1, 1], [], []>} : vector<7x14xf32>, vector<14x32xf32>, vector<7x32xf32> -> vector<7x32xf32>
    %c0_4 = arith.constant 0 : index
    %c0_5 = arith.constant 0 : index
    %c0_6 = arith.constant 0 : index
    %4 = vector.load %arg2[%c0_4, %c0_5, %c0_6] : memref<1x7x24xf32, #tpu.memory_space<vmem>>, vector<1x7x24xf32>
    %5 = vector.shape_cast %4 : vector<1x7x24xf32> to vector<7x24xf32>
    %c16 = arith.constant 16 : index
    %c0_7 = arith.constant 0 : index
    %6 = vector.load %arg5[%c16, %c0_7] : memref<104x32xf32, #tpu.memory_space<vmem>>, vector<24x32xf32>
    %cst_8 = arith.constant dense<0.000000e+00> : vector<7x32xf32>
    %7 = tpu.matmul %5, %6, %cst_8 {dimension_numbers = #tpu.dot_dimension_numbers<[1], [0], [0], [1], [0, 0, 1, 1], [], []>} : vector<7x24xf32>, vector<24x32xf32>, vector<7x32xf32> -> vector<7x32xf32>
    %8 = arith.addf %3, %7 : vector<7x32xf32>
    %c0_9 = arith.constant 0 : index
    %c0_10 = arith.constant 0 : index
    %c0_11 = arith.constant 0 : index
    %9 = vector.load %arg3[%c0_9, %c0_10, %c0_11] : memref<1x7x7xf32, #tpu.memory_space<vmem>>, vector<1x7x7xf32>
    %10 = vector.shape_cast %9 : vector<1x7x7xf32> to vector<7x7xf32>
    %c40 = arith.constant 40 : index
    %c0_12 = arith.constant 0 : index
    %11 = vector.load %arg5[%c40, %c0_12] : memref<104x32xf32, #tpu.memory_space<vmem>>, vector<7x32xf32>
    %cst_13 = arith.constant dense<0.000000e+00> : vector<7x32xf32>
    %12 = tpu.matmul %10, %11, %cst_13 {dimension_numbers = #tpu.dot_dimension_numbers<[1], [0], [0], [1], [0, 0, 1, 1], [], []>} : vector<7x7xf32>, vector<7x32xf32>, vector<7x32xf32> -> vector<7x32xf32>
    %13 = arith.addf %8, %12 : vector<7x32xf32>
    %c0_14 = arith.constant 0 : index
    %c0_15 = arith.constant 0 : index
    %c0_16 = arith.constant 0 : index
    %14 = vector.load %arg4[%c0_14, %c0_15, %c0_16] : memref<1x7x12xf32, #tpu.memory_space<vmem>>, vector<1x7x12xf32>
    %15 = vector.shape_cast %14 : vector<1x7x12xf32> to vector<7x12xf32>
    %c48 = arith.constant 48 : index
    %c0_17 = arith.constant 0 : index
    %16 = vector.load %arg5[%c48, %c0_17] : memref<104x32xf32, #tpu.memory_space<vmem>>, vector<12x32xf32>
    %cst_18 = arith.constant dense<0.000000e+00> : vector<7x32xf32>
    %17 = tpu.matmul %15, %16, %cst_18 {dimension_numbers = #tpu.dot_dimension_numbers<[1], [0], [0], [1], [0, 0, 1, 1], [], []>} : vector<7x12xf32>, vector<12x32xf32>, vector<7x32xf32> -> vector<7x32xf32>
    %18 = arith.addf %13, %17 : vector<7x32xf32>
    %c96 = arith.constant 96 : index
    %c0_19 = arith.constant 0 : index
    %19 = vector.load %arg5[%c96, %c0_19] : memref<104x32xf32, #tpu.memory_space<vmem>>, vector<1x32xf32>
    %20 = vector.broadcast %19 : vector<1x32xf32> to vector<7x32xf32>
    %21 = arith.addf %18, %20 : vector<7x32xf32>
    %22 = math.tanh %21 : vector<7x32xf32>
    %c64 = arith.constant 64 : index
    %c0_20 = arith.constant 0 : index
    %23 = vector.load %arg5[%c64, %c0_20] : memref<104x32xf32, #tpu.memory_space<vmem>>, vector<32x32xf32>
    %cst_21 = arith.constant dense<0.000000e+00> : vector<7x32xf32>
    %24 = tpu.matmul %22, %23, %cst_21 {dimension_numbers = #tpu.dot_dimension_numbers<[1], [0], [0], [1], [0, 0, 1, 1], [], []>} : vector<7x32xf32>, vector<32x32xf32>, vector<7x32xf32> -> vector<7x32xf32>
    %c97 = arith.constant 97 : index
    %c0_22 = arith.constant 0 : index
    %25 = vector.load %arg5[%c97, %c0_22] : memref<104x32xf32, #tpu.memory_space<vmem>>, vector<1x32xf32>
    %26 = vector.broadcast %25 : vector<1x32xf32> to vector<7x32xf32>
    %27 = arith.addf %24, %26 : vector<7x32xf32>
    %c0_23 = arith.constant 0 : index
    %c0_24 = arith.constant 0 : index
    %c0_25 = arith.constant 0 : index
    %28 = vector.load %arg6[%c0_23, %c0_24, %c0_25] : memref<1x7x32xf32, #tpu.memory_space<vmem>>, vector<1x7x32xf32>
    %29 = vector.shape_cast %28 : vector<1x7x32xf32> to vector<7x32xf32>
    %30 = vector.shape_cast %27 : vector<7x32xf32> to vector<1x7x32xf32>
    tpu.vector_store %arg6[%c0_23, %c0_24, %c0_25], %30 {strides = array<i32>} : memref<1x7x32xf32, #tpu.memory_space<vmem>>, vector<1x7x32xf32>,
    return
  }
  func.func @transform_0(%arg0: i32) -> (i32, i32, i32) {
    %c0_i32 = arith.constant 0 : i32
    %c0_i32_0 = arith.constant 0 : i32
    %c0_i32_1 = arith.constant 0 : i32
    return %arg0, %c0_i32, %c0_i32_0 : i32, i32, i32
  }
  func.func @transform_1(%arg0: i32) -> (i32, i32, i32) {
    %c0_i32 = arith.constant 0 : i32
    %c0_i32_0 = arith.constant 0 : i32
    %c0_i32_1 = arith.constant 0 : i32
    return %arg0, %c0_i32, %c0_i32_0 : i32, i32, i32
  }
  func.func @transform_2(%arg0: i32) -> (i32, i32, i32) {
    %c0_i32 = arith.constant 0 : i32
    %c0_i32_0 = arith.constant 0 : i32
    %c0_i32_1 = arith.constant 0 : i32
    return %arg0, %c0_i32, %c0_i32_0 : i32, i32, i32
  }
  func.func @transform_3(%arg0: i32) -> (i32, i32, i32) {
    %c0_i32 = arith.constant 0 : i32
    %c0_i32_0 = arith.constant 0 : i32
    %c0_i32_1 = arith.constant 0 : i32
    return %arg0, %c0_i32, %c0_i32_0 : i32, i32, i32
  }
  func.func @transform_4(%arg0: i32) -> (i32, i32) {
    %c0_i32 = arith.constant 0 : i32
    %c0_i32_0 = arith.constant 0 : i32
    %c0_i32_1 = arith.constant 0 : i32
    return %c0_i32, %c0_i32_0 : i32, i32
  }
  func.func @transform_5(%arg0: i32) -> (i32, i32, i32) {
    %c0_i32 = arith.constant 0 : i32
    %c0_i32_0 = arith.constant 0 : i32
    %c0_i32_1 = arith.constant 0 : i32
    return %arg0, %c0_i32, %c0_i32_0 : i32, i32, i32
  }
}

</mosaic_0001>

<bundles_post_ra>
// kernel: madafaka_forward.1
= control target key start
LH: loop header
LB: loop body
LE: loop exit
PB: predicated region body
PF: predicated region fallthrough
CT: control target
= control target key end

     0   :  { %s925_s18 = smov 0   ;;  %s1007_s0 = inlined_call_operand.vmem [shape: f32[4,7,14], index: 0, kind: input, shape index: {}]   ;;  %s1008_s1 = inlined_call_operand.vmem [shape: f32[4,7,24], index: 1, kind: input, shape index: {}]   ;;  %s1009_s2 = inlined_call_operand.vmem [shape: f32[4,7,7], index: 2, kind: input, shape index: {}]   ;;  %s1010_s3 = inlined_call_operand.vmem [shape: f32[4,7,12], index: 3, kind: input, shape index: {}]   ;;  %s1011_s4 = inlined_call_operand.vmem [shape: f32[104,32], index: 4, kind: input, shape index: {}]   ;;  %s1012_s5 = inlined_call_operand.vmem [shape: f32[4,7,32], index: 5, kind: output, shape index: {}]  }
   0x1 LB: > { %s774_s19 = sadd.s32 4294967295, %s889_s18   ;;  %p778_p0 = scmp.ge.s32.totalorder %s889_s18, 1  ;;  %s889_s18 = sphi %s925_s18, %s15_s18  }
   0x2   : > { %p213_p1 = scmp.lt.s32.totalorder %s889_s18, 5 }
   0x4   : > { %p214_p2 = pnand %p778_p0, %p213_p1 }
   0x5   : > { %v275_v0 = vld [vmem:[%s1011_s4 + $0x10] sm:$0xff] (!%p214_p2)  ;;  %v276_v1 = vld [vmem:[%s1011_s4 + $0x18] sm:$0xff] (!%p214_p2)  ;;  %v891_v2 = vmov (!%p214_p2), 0.0|0.0   ;;  %vm892_vm0 = vmmov (!%p214_p2), 0   ;;  %v893_v4 = vmov (!%p214_p2), 0.0   ;;  %p251_p3 = scmp.lt.s32.totalorder (!%p214_p2), %s774_s19, 3 }
   0x6   : > { %217 = sbr.rel (%p214_p2) target bundleno = 467 (0x1d3), region = 40  ;;  %852 = vmatprep.subr.bf16.mxu0 (!%p214_p2), %v891_v2  ;;  %v853_v3 = vpack.c.bf16 (!%p214_p2), %v276_v1, %v275_v0  ;;  %819 = vmatprep.mubr.msk.f32.mxu0 (!%p214_p2), %vm892_vm0, %v893_v4  ;;  %v272_v5 = vld [vmem:[%s1011_s4] sm:$0xff] (!%p214_p2)  ;;  %v273_v6 = vld [vmem:[%s1011_s4 + $0x8] sm:$0x3f] (!%p214_p2)  ;;  %vm436_vm1 = vcmask (!%p214_p2), 1046528   ;;  %vm356_vm2 = vcmask (!%p214_p2), 1045504  }
   0x7   : > { %829 = vmatprep.subr.mxu1 (!%p214_p2), %v893_v4  ;;  %v431_v7 = vld [vmem:[%s1011_s4 + $0x28] sm:$0x7f] (!%p214_p2)  ;;  %831 = vmatprep.mubr.msk.f32.mxu1 (!%p214_p2), %vm892_vm0, %v893_v4  ;;  %v277_v8 = vld [vmem:[%s1011_s4 + $0x20] sm:$0xff] (!%p214_p2)  ;;  %vm278_vm3 = vcmask (!%p214_p2), 195584   ;;  %v856_v9 = vpack.c.bf16 (!%p214_p2), %v273_v6, %v272_v5  ;;  %vm894_vm4 = vmmov (!%p214_p2), 1   ;;  %v512_v10 = vld [vmem:[%s1011_s4 + $0x30] sm:$0xff] (!%p214_p2) }
   0x8   : > { %854 = vmatpush3.bf16.msra.mxu0 (!%p214_p2), %v853_v3  ;;  %830 = vmatpush3.msk.msra.mxu1 (!%p214_p2), %vm436_vm1, %v431_v7  ;;  %vm857_vm5 = vmpackc.low (!%p214_p2), %vm356_vm2, %vm894_vm4  ;;  %v513_v11 = vld [vmem:[%s1011_s4 + $0x38] sm:$0xf] (!%p214_p2)  ;;  %vm518_vm6 = vcmask (!%p214_p2), 1043456   ;;  %vm432_vm7 = vcmask (!%p214_p2), 56320   ;;  %vm352_vm8 = vcmask (!%p214_p2), 113664   ;;  %vm514_vm10 = vcmask (!%p214_p2), 97280  }
   0x9   : > { %817 = vmatprep.subr.mxu0 (!%p214_p2), %v893_v4  ;;  %863 = vmatprep.subr.bf16.mxu1 (!%p214_p2), %v891_v2  ;;  %v860_v15 = vpack.c.bf16 (!%p214_p2), %v513_v11, %v512_v10  ;;  %vm861_vm9 = vmpackc.low (!%p214_p2), %vm518_vm6, %vm894_vm4  ;;  %v600_v17 = vld [vmem:[%s1011_s4 + $0x40] sm:$0xff] (!%p214_p2)  ;;  %v601_v18 = vld [vmem:[%s1011_s4 + $0x48] sm:$0xff] (!%p214_p2)  ;;  %vm609_vm11 = vcmask (!%p214_p2), 261120   ;;  %vm683_vm12 = vcmask (!%p214_p2), 260096  }
   0xa   : > { %v602_v19 = vld [vmem:[%s1011_s4 + $0x50] sm:$0xff] (!%p214_p2)  ;;  %v864_v20 = vpack.c.bf16 (!%p214_p2), %v601_v18, %v600_v17  ;;  %v603_v21 = vld [vmem:[%s1011_s4 + $0x58] sm:$0xff] (!%p214_p2)  ;;  %v791_v32 = vld [vmem:[%s1011_s4 + $0x60] ss:$0 sm:$0xff] (!%p214_p2) }
   0xb   : > { %v867_v22 = vpack.c.bf16 (!%p214_p2), %v603_v21, %v602_v19  ;;  %v792_v37 = vld [vmem:[%s1011_s4 + $0x61] ss:$0 sm:$0xff] (!%p214_p2) }
   0xc   : > { %818 = vmatpush3.msra.mxu0 (!%p214_p2), %v277_v8 }
   0xd   : > { %s1014_s19 = smov (!%p251_p3, %s774_s19), 3  ;;  %855 = vmatprep.subr.bf16.mxu0 %v891_v2 }
   0xe   : > { %s953_s7 = sshll.u32 %s1014_s19, 3 }
   0xf   : > { %s258_s10 = scalar_lea.vmem %s1008_s1, %s953_s7  ;;  %s254_s13 = scalar_lea.vmem %s1007_s0, %s953_s7 }
  0x10   : > { %v274_v12 = vld [vmem:[%s258_s10] sm:$0x7f]  ;;  %s262_s21 = scalar_lea.vmem %s1009_s2, %s953_s7  ;;  %s266_s24 = scalar_lea.vmem %s1010_s3, %s953_s7 }
  0x11   : > { %820 = vmatmul.mubr.msk.f32.vlgmr.msra.gmra.mrb[0].mxu0 %vm278_vm3, %v274_v12  ;;  %v430_v13 = vld [vmem:[%s262_s21] sm:$0x7f]  ;;  %s270_s15 = scalar_lea.vmem %s1012_s5, %s953_s7 }
  0x12   : > { %858 = vmatpush3.bf16.msk.msra.mxu0 %vm857_vm5, %v856_v9  ;;  %826 = vmatprep.mubr.msk.f32.mxu0 %vm892_vm0, %v893_v4  ;;  %v271_v14 = vld [vmem:[%s254_s13] sm:$0x7f] }
  0x13   : > { %859 = vmatprep.subr.bf16.mxu0 %v891_v2  ;;  %832 = vmatmul.mubr.msk.f32.vlgmr.msra.gmra.mrb[0].mxu1 %vm432_vm7, %v430_v13  ;;  %v511_v16 = vld [vmem:[%s266_s24] sm:$0x7f] }
  0x14   : > { %849 = vmatprep.mubr.msk.f32.mxu1 %vm892_vm0, %v893_v4  ;;  %865 = vmatpush3.bf16.msra.mxu1 %v864_v20 }
  0x15   : > { %827 = vmatmul.mubr.msk.f32.vlgmr.msra.gmra.mrb[2].mxu0 %vm352_vm8, %v271_v14  ;;  %866 = vmatprep.subr.bf16.mxu1 %v891_v2 }
  0x16   : > { %862 = vmatpush3.bf16.msk.msra.mxu0 %vm861_vm9, %v860_v15  ;;  %838 = vmatprep.mubr.msk.f32.mxu0 %vm892_vm0, %v893_v4 }
  0x18   : > { %868 = vmatpush3.bf16.msra.mxu1 %v867_v22 }
  0x19   : > { %839 = vmatmul.mubr.msk.f32.vlgmr.msra.gmra.mrb[4].mxu0 %vm514_vm10, %v511_v16 }
  0xe4   : > { %v348_v23 = vpop.f32.mrb[0].mxu0 }
  0xe5   : > { %v821_v24 = vpop.f32.mrb[1].mxu0 }
  0xe6   : > { %v506_v25 = vpop.f32.mrb[0].mxu1 }
  0xe7   : > { %v833_v26 = vpop.f32.mrb[1].mxu1 }
  0xe8   : > { %v426_v27 = vpop.f32.mrb[2].mxu0 }
  0xe9   : > { %v427_v28 = vadd.f32 %v426_v27, %v348_v23  ;;  %v828_v29 = vpop.f32.mrb[3].mxu0 }
  0xeb   : > { %v510_v30 = vadd.f32 %v506_v25, %v427_v28 }
  0xec   : > { %v588_v31 = vpop.f32.mrb[4].mxu0 }
  0xed   : > { %v592_v33 = vadd.f32 %v588_v31, %v510_v30  ;;  %v840_v34 = vpop.f32.mrb[5].mxu0 }
  0xef   : > { %v598_v35 = vadd.f32 %v791_v32, %v592_v33 }
  0xf1   : > { %881 = vtanh.f32 %v598_v35 }
  0xfb   : > { %v882_v36 = vpop.eup %881 }
  0xfc   : > { %850 = vmatmul.mubr.msk.f32.vlgmr.msra.gmra.mrb[2].mxu1 %vm609_vm11, %v882_v36 }
 0x1cf   : > { %v679_v38 = vpop.f32.mrb[2].mxu1 }
 0x1d0   : > { %v680_v39 = vadd.f32 %v792_v37, %v679_v38  ;;  %v851_v40 = vpop.f32.mrb[3].mxu1 }
 0x1d2   : > { %684 = vst.msk [vmem:[%s270_s15] sm:$0x7f] %vm683_vm12, %v680_v39 }
 0x1d3 PF: > { %s15_s18 = sadd.s32 1, %s889_s18  }
 0x1d4   : > { %p12_p4 = scmp.ge.s32.totalorder %s15_s18, 6  }
 0x1d6   :  { %14 = sbr.rel (!%p12_p4) target bundleno = 1 (0x1), region = 79 }

</bundles_post_ra>
